<compile_context>
chip_gen: v7x
topology: tpu7x:2x2x1
jax: 0.10.0
libtpu: 0.0.40
codegen_flags: <defaults>
</compile_context>

<pallas_src>
import functools

import jax
import jax.numpy as jnp
from jax.experimental import pallas as pl
from jax.experimental.pallas import tpu as pltpu

NEG_SLOPE = 0.01   # torch.nn.LeakyReLU default
LN_EPS = 1e-5      # torch.nn.LayerNorm default (must stay > 0: padded batch
                   # rows are constant -> var=0 -> rsqrt relies on eps)
LANE = 128
_TB_MAX = 4096     # per-step batch tile cap (safe on v5e's scoped VMEM)


def _round_up(n, m):
    return ((n + m - 1) // m) * m


def _leaky_relu(x):
    return jnp.where(x >= 0, x, NEG_SLOPE * x)


def _layer_norm_onepass(x, gamma, beta, inv_n):
    # LayerNorm over the (zero-padded) feature axis.  Padded lanes of x, gamma
    # and beta are exactly 0, so sums over 128 lanes equal sums over the true
    # nf lanes; the divisor inv_n = 1/nf keeps the statistics correct and the
    # padded lanes come out as exactly 0 again (gamma=beta=0 there).
    s = jnp.sum(x, axis=-1, keepdims=True)
    s2 = jnp.sum(x * x, axis=-1, keepdims=True)
    mean = s * inv_n
    var = jnp.maximum(s2 * inv_n - mean * mean, 0.0)   # guard f32 cancellation
    inv = jax.lax.rsqrt(var + LN_EPS)
    return (x - mean) * inv * gamma + beta


def _dot(a, b):
    # Default matmul precision matches the pure-JAX reference.  For bit-level
    # parity with a PyTorch f32 forward, pass precision=lax.Precision.HIGHEST
    # here and in the reference (free: this kernel is not MXU-bound).
    return jnp.dot(a, b, preferred_element_type=jnp.float32)


def qnetwork_kernel(x_ref, w1_ref, w23_ref, w4_ref, pv_ref, out_ref, *, true_nf):
    nf_pad = w1_ref.shape[1]
    out_pad = out_ref.shape[1]
    inv_n = 1.0 / float(true_nf)

    # Hoist all (1, F) parameter rows once (broadcasts not re-materialized).
    b1 = pv_ref[0:1, :nf_pad]
    b2 = pv_ref[1:2, :nf_pad]
    b3 = pv_ref[2:3, :nf_pad]
    g1 = pv_ref[3:4, :nf_pad]
    g2 = pv_ref[4:5, :nf_pad]
    g3 = pv_ref[5:6, :nf_pad]
    be1 = pv_ref[6:7, :nf_pad]
    be2 = pv_ref[7:8, :nf_pad]
    be3 = pv_ref[8:9, :nf_pad]
    b4 = pv_ref[9:10, :out_pad]

    # x = log(x)
    h = jnp.log(x_ref[...])

    # Block 1: Linear -> LeakyReLU -> LayerNorm (all lane-dense, 128 wide)
    h = _dot(h, w1_ref[...]) + b1
    h = _leaky_relu(h)
    h = _layer_norm_onepass(h, g1, be1, inv_n)

    # Block 2
    h = _dot(h, w23_ref[0]) + b2
    h = _leaky_relu(h)
    h = _layer_norm_onepass(h, g2, be2, inv_n)

    # Block 3
    h = _dot(h, w23_ref[1]) + b3
    h = _leaky_relu(h)
    h = _layer_norm_onepass(h, g3, be3, inv_n)

    # Output head (lane-padded to 128; consumer slices back to out_dim).
    out_ref[...] = _dot(h, w4_ref[...]) + b4


def pack_params(params):
    """Consolidate 15 raw parameters into 4 lane-dense kernel operands.

    All feature axes are zero-padded to 128 lanes.  Zero padding is required
    (not just convenient): it keeps the padded activation lanes exactly zero
    and the LayerNorm sums equal to the true-nf sums.
    """
    in_dim, nf = params["w1"].shape
    out_dim = params["w4"].shape[1]
    nf_pad = _round_up(nf, LANE)
    out_pad = _round_up(out_dim, LANE)
    p = max(nf_pad, out_pad)

    def padv(v):
        return jnp.pad(v, (0, p - v.shape[0]))          # zero pad

    pv = jnp.stack([
        padv(params["b1"]), padv(params["b2"]), padv(params["b3"]),
        padv(params["g1"]), padv(params["g2"]), padv(params["g3"]),
        padv(params["be1"]), padv(params["be2"]), padv(params["be3"]),
        padv(params["b4"]),
    ])                                                   # (10, p)

    w1p = jnp.pad(params["w1"], ((0, 0), (0, nf_pad - nf)))
    w2p = jnp.pad(params["w2"], ((0, nf_pad - nf), (0, nf_pad - nf)))
    w3p = jnp.pad(params["w3"], ((0, nf_pad - nf), (0, nf_pad - nf)))
    w23p = jnp.stack([w2p, w3p])                         # (2, nf_pad, nf_pad)
    w4p = jnp.pad(params["w4"], ((0, nf_pad - nf), (0, out_pad - out_dim)))
    return {"w1": w1p, "w23": w23p, "w4": w4p, "pv": pv}


def _pick_batch_tiling(B):
    """Pick (tile_rows, n_tiles).

    Big tiles amortize the ~0.35us/step pipeline overhead; an even tile count
    >= 2 at large B lets v7x's two TensorCores split the 'parallel' batch axis
    (neutral on single-TC v5e/v6e).
    """
    if B <= 1024:
        return B, 1
    if B <= 2 * _TB_MAX:
        return _round_up(pl.cdiv(B, 2), 8), 2
    n = pl.cdiv(B, _TB_MAX)
    n += n % 2                      # even tile count -> balanced on v7x
    return _TB_MAX, n


@functools.partial(jax.jit, static_argnames=("nf",))
def qnetwork_forward_padded(x, packed, *, nf):
    """x: [B, in_dim] float32 (positive); packed: pack_params(...) output.

    Returns the PADDED output [b_pad, 128]; the consumer slices [:B, :out_dim]
    (kept out of this wrapper so the kernel's output HBM traffic isn't doubled
    by a separate slice op).
    """
    B, in_dim = x.shape
    w1, w23, w4, pv = packed["w1"], packed["w23"], packed["w4"], packed["pv"]
    nf_pad = w1.shape[1]
    out_pad = w4.shape[1]
    p = pv.shape[1]

    tb, n_tiles = _pick_batch_tiling(B)
    b_pad = tb * n_tiles
    if b_pad != B:
        # log(1) = 0: padding rows are benign (LN eps keeps rsqrt finite on
        # the resulting constant rows).
        x = jnp.pad(x, ((0, b_pad - B), (0, 0)), constant_values=1.0)

    kernel = functools.partial(qnetwork_kernel, true_nf=nf)

    return pl.pallas_call(
        kernel,
        out_shape=jax.ShapeDtypeStruct((b_pad, out_pad), jnp.float32),
        grid=(n_tiles,),
        in_specs=[
            pl.BlockSpec((tb, in_dim), lambda i: (i, 0)),
            pl.BlockSpec((in_dim, nf_pad), lambda i: (0, 0)),
            pl.BlockSpec((2, nf_pad, nf_pad), lambda i: (0, 0, 0)),
            pl.BlockSpec((nf_pad, out_pad), lambda i: (0, 0)),
            pl.BlockSpec((10, p), lambda i: (0, 0)),
        ],
        out_specs=pl.BlockSpec((tb, out_pad), lambda i: (i, 0)),
        compiler_params=pltpu.CompilerParams(
            dimension_semantics=("parallel",),
            vmem_limit_bytes=32 * 1024 * 1024,   # headroom for 4096-row tiles on v5e
        ),
    )(x, w1, w23, w4, pv)


def xavier_uniform(key, fan_in, fan_out, dtype=jnp.float32):
    # torch.nn.init.xavier_uniform_ (gain=1): U(-a, a), a = sqrt(6/(fan_in+fan_out))
    a = (6.0 / (fan_in + fan_out)) ** 0.5
    return jax.random.uniform(key, (fan_in, fan_out), dtype, minval=-a, maxval=a)


def init_params(key, in_dim, nf, out_dim):
    k1, k2, k3, k4 = jax.random.split(key, 4)
    return {
        # Linear weights stored transposed: [fan_in, fan_out]
        "w1": xavier_uniform(k1, in_dim, nf), "b1": jnp.zeros((nf,), jnp.float32),
        "g1": jnp.ones((nf,), jnp.float32),   "be1": jnp.zeros((nf,), jnp.float32),
        "w2": xavier_uniform(k2, nf, nf),     "b2": jnp.zeros((nf,), jnp.float32),
        "g2": jnp.ones((nf,), jnp.float32),   "be2": jnp.zeros((nf,), jnp.float32),
        "w3": xavier_uniform(k3, nf, nf),     "b3": jnp.zeros((nf,), jnp.float32),
        "g3": jnp.ones((nf,), jnp.float32),   "be3": jnp.zeros((nf,), jnp.float32),
        "w4": xavier_uniform(k4, nf, out_dim), "b4": jnp.zeros((out_dim,), jnp.float32),
    }


def qnetwork_reference(x, params):
    """Pure-JAX reference mirroring the PyTorch forward, for validation."""
    h = jnp.log(x)
    for i in (1, 2, 3):
        h = h @ params[f"w{i}"] + params[f"b{i}"]
        h = _leaky_relu(h)
        mean = jnp.mean(h, axis=-1, keepdims=True)
        var = jnp.mean(jnp.square(h - mean), axis=-1, keepdims=True)
        h = (h - mean) / jnp.sqrt(var + LN_EPS) * params[f"g{i}"] + params[f"be{i}"]
    return h @ params["w4"] + params["b4"]


if __name__ == "__main__":
    in_dim, nf, out_dim = 16, 32, 4
    batch = 8

    key = jax.random.PRNGKey(0)
    kx, kp = jax.random.split(key)

    # Inputs must be positive (forward takes log(x)).
    x = jax.random.uniform(kx, (batch, in_dim), jnp.float32, minval=0.5, maxval=2.0)
    params = init_params(kp, in_dim, nf, out_dim)
    packed = pack_params(params)

    out_padded = qnetwork_forward_padded(x, packed, nf=nf)
    out_padded = jax.block_until_ready(out_padded)

    # Consumer-side slice back to the logical shape (kept out of the kernel
    # wrapper on purpose; fuse it into the downstream jit in real use).
    out = out_padded[:batch, :out_dim]

    ref = qnetwork_reference(x, params)
    assert out.shape == (batch, out_dim), out.shape
    assert jnp.allclose(out, ref, atol=1e-3, rtol=1e-3), (
        f"max abs err = {jnp.max(jnp.abs(out - ref))}"
    )

    print("KERNEL_OK")
</pallas_src>

<mosaic_0001>
module attributes {stable_mosaic.version = 11 : i64} {
  func.func @qnetwork_kernel(%arg0: i32, %arg1: memref<8x16xf32, #tpu.memory_space<vmem>>, %arg2: memref<16x128xf32, #tpu.memory_space<vmem>>, %arg3: memref<2x128x128xf32, #tpu.memory_space<vmem>>, %arg4: memref<128x128xf32, #tpu.memory_space<vmem>>, %arg5: memref<10x128xf32, #tpu.memory_space<vmem>>, %arg6: memref<8x128xf32, #tpu.memory_space<vmem>>) attributes {dimension_semantics = [#tpu.dimension_semantics<parallel>], iteration_bounds = array<i64: 1>, scalar_prefetch = 0 : i64, scratch_operands = 0 : i64, tpu.core_type = #tpu.core_type<tc>, window_params = [{transform_indices = @transform_0, window_bounds = array<i64: 8, 16>}, {pipeline_mode = #tpu.pipeline_mode<synchronous>, transform_indices = @transform_1, window_bounds = array<i64: 16, 128>}, {pipeline_mode = #tpu.pipeline_mode<synchronous>, transform_indices = @transform_2, window_bounds = array<i64: 2, 128, 128>}, {pipeline_mode = #tpu.pipeline_mode<synchronous>, transform_indices = @transform_3, window_bounds = array<i64: 128, 128>}, {pipeline_mode = #tpu.pipeline_mode<synchronous>, transform_indices = @transform_4, window_bounds = array<i64: 10, 128>}, {transform_indices = @transform_5, window_bounds = array<i64: 8, 128>}]} {
    %c0 = arith.constant 0 : index
    %c0_0 = arith.constant 0 : index
    %0 = vector.load %arg5[%c0, %c0_0] : memref<10x128xf32, #tpu.memory_space<vmem>>, vector<1x128xf32>
    %c1 = arith.constant 1 : index
    %c0_1 = arith.constant 0 : index
    %1 = vector.load %arg5[%c1, %c0_1] : memref<10x128xf32, #tpu.memory_space<vmem>>, vector<1x128xf32>
    %c2 = arith.constant 2 : index
    %c0_2 = arith.constant 0 : index
    %2 = vector.load %arg5[%c2, %c0_2] : memref<10x128xf32, #tpu.memory_space<vmem>>, vector<1x128xf32>
    %c3 = arith.constant 3 : index
    %c0_3 = arith.constant 0 : index
    %3 = vector.load %arg5[%c3, %c0_3] : memref<10x128xf32, #tpu.memory_space<vmem>>, vector<1x128xf32>
    %c4 = arith.constant 4 : index
    %c0_4 = arith.constant 0 : index
    %4 = vector.load %arg5[%c4, %c0_4] : memref<10x128xf32, #tpu.memory_space<vmem>>, vector<1x128xf32>
    %c5 = arith.constant 5 : index
    %c0_5 = arith.constant 0 : index
    %5 = vector.load %arg5[%c5, %c0_5] : memref<10x128xf32, #tpu.memory_space<vmem>>, vector<1x128xf32>
    %c6 = arith.constant 6 : index
    %c0_6 = arith.constant 0 : index
    %6 = vector.load %arg5[%c6, %c0_6] : memref<10x128xf32, #tpu.memory_space<vmem>>, vector<1x128xf32>
    %c7 = arith.constant 7 : index
    %c0_7 = arith.constant 0 : index
    %7 = vector.load %arg5[%c7, %c0_7] : memref<10x128xf32, #tpu.memory_space<vmem>>, vector<1x128xf32>
    %c8 = arith.constant 8 : index
    %c0_8 = arith.constant 0 : index
    %8 = vector.load %arg5[%c8, %c0_8] : memref<10x128xf32, #tpu.memory_space<vmem>>, vector<1x128xf32>
    %c9 = arith.constant 9 : index
    %c0_9 = arith.constant 0 : index
    %9 = vector.load %arg5[%c9, %c0_9] : memref<10x128xf32, #tpu.memory_space<vmem>>, vector<1x128xf32>
    %c0_10 = arith.constant 0 : index
    %c0_11 = arith.constant 0 : index
    %10 = vector.load %arg1[%c0_10, %c0_11] : memref<8x16xf32, #tpu.memory_space<vmem>>, vector<8x16xf32>
    %11 = math.log %10 : vector<8x16xf32>
    %c0_12 = arith.constant 0 : index
    %c0_13 = arith.constant 0 : index
    %12 = vector.load %arg2[%c0_12, %c0_13] : memref<16x128xf32, #tpu.memory_space<vmem>>, vector<16x128xf32>
    %cst = arith.constant dense<0.000000e+00> : vector<8x128xf32>
    %13 = tpu.matmul %11, %12, %cst {dimension_numbers = #tpu.dot_dimension_numbers<[1], [0], [0], [1], [0, 0, 1, 1], [], []>} : vector<8x16xf32>, vector<16x128xf32>, vector<8x128xf32> -> vector<8x128xf32>
    %14 = vector.broadcast %0 : vector<1x128xf32> to vector<8x128xf32>
    %15 = arith.addf %13, %14 : vector<8x128xf32>
    %cst_14 = arith.constant 0.000000e+00 : f32
    %16 = vector.broadcast %cst_14 : f32 to vector<8x128xf32>
    %17 = arith.cmpf oge, %15, %16 : vector<8x128xf32>
    %cst_15 = arith.constant 0.00999999977 : f32
    %18 = vector.broadcast %cst_15 : f32 to vector<8x128xf32>
    %19 = arith.mulf %18, %15 : vector<8x128xf32>
    %20 = arith.select %17, %15, %19 : vector<8x128xi1>, vector<8x128xf32>
    %cst_16 = arith.constant dense<0.000000e+00> : vector<8xf32>
    %21 = vector.multi_reduction <add>, %20, %cst_16 [1] : vector<8x128xf32> to vector<8xf32>
    %22 = vector.shape_cast %21 : vector<8xf32> to vector<8x1xf32>
    %23 = arith.mulf %20, %20 : vector<8x128xf32>
    %cst_17 = arith.constant dense<0.000000e+00> : vector<8xf32>
    %24 = vector.multi_reduction <add>, %23, %cst_17 [1] : vector<8x128xf32> to vector<8xf32>
    %25 = vector.shape_cast %24 : vector<8xf32> to vector<8x1xf32>
    %cst_18 = arith.constant 3.125000e-02 : f32
    %26 = vector.broadcast %cst_18 : f32 to vector<8x1xf32>
    %27 = arith.mulf %22, %26 : vector<8x1xf32>
    %cst_19 = arith.constant 3.125000e-02 : f32
    %28 = vector.broadcast %cst_19 : f32 to vector<8x1xf32>
    %29 = arith.mulf %25, %28 : vector<8x1xf32>
    %30 = arith.mulf %27, %27 : vector<8x1xf32>
    %31 = arith.subf %29, %30 : vector<8x1xf32>
    %cst_20 = arith.constant 0.000000e+00 : f32
    %32 = vector.broadcast %cst_20 : f32 to vector<8x1xf32>
    %33 = arith.maximumf %31, %32 : vector<8x1xf32>
    %cst_21 = arith.constant 9.99999974E-6 : f32
    %34 = vector.broadcast %cst_21 : f32 to vector<8x1xf32>
    %35 = arith.addf %33, %34 : vector<8x1xf32>
    %36 = math.rsqrt %35 : vector<8x1xf32>
    %37 = vector.broadcast %27 : vector<8x1xf32> to vector<8x128xf32>
    %38 = arith.subf %20, %37 : vector<8x128xf32>
    %39 = vector.broadcast %36 : vector<8x1xf32> to vector<8x128xf32>
    %40 = arith.mulf %38, %39 : vector<8x128xf32>
    %41 = vector.broadcast %3 : vector<1x128xf32> to vector<8x128xf32>
    %42 = arith.mulf %40, %41 : vector<8x128xf32>
    %43 = vector.broadcast %6 : vector<1x128xf32> to vector<8x128xf32>
    %44 = arith.addf %42, %43 : vector<8x128xf32>
    %c0_22 = arith.constant 0 : index
    %c0_23 = arith.constant 0 : index
    %c0_24 = arith.constant 0 : index
    %45 = vector.load %arg3[%c0_22, %c0_23, %c0_24] : memref<2x128x128xf32, #tpu.memory_space<vmem>>, vector<1x128x128xf32>
    %46 = vector.shape_cast %45 : vector<1x128x128xf32> to vector<128x128xf32>
    %cst_25 = arith.constant dense<0.000000e+00> : vector<8x128xf32>
    %47 = tpu.matmul %44, %46, %cst_25 {dimension_numbers = #tpu.dot_dimension_numbers<[1], [0], [0], [1], [0, 0, 1, 1], [], []>} : vector<8x128xf32>, vector<128x128xf32>, vector<8x128xf32> -> vector<8x128xf32>
    %48 = vector.broadcast %1 : vector<1x128xf32> to vector<8x128xf32>
    %49 = arith.addf %47, %48 : vector<8x128xf32>
    %cst_26 = arith.constant 0.000000e+00 : f32
    %50 = vector.broadcast %cst_26 : f32 to vector<8x128xf32>
    %51 = arith.cmpf oge, %49, %50 : vector<8x128xf32>
    %cst_27 = arith.constant 0.00999999977 : f32
    %52 = vector.broadcast %cst_27 : f32 to vector<8x128xf32>
    %53 = arith.mulf %52, %49 : vector<8x128xf32>
    %54 = arith.select %51, %49, %53 : vector<8x128xi1>, vector<8x128xf32>
    %cst_28 = arith.constant dense<0.000000e+00> : vector<8xf32>
    %55 = vector.multi_reduction <add>, %54, %cst_28 [1] : vector<8x128xf32> to vector<8xf32>
    %56 = vector.shape_cast %55 : vector<8xf32> to vector<8x1xf32>
    %57 = arith.mulf %54, %54 : vector<8x128xf32>
    %cst_29 = arith.constant dense<0.000000e+00> : vector<8xf32>
    %58 = vector.multi_reduction <add>, %57, %cst_29 [1] : vector<8x128xf32> to vector<8xf32>
    %59 = vector.shape_cast %58 : vector<8xf32> to vector<8x1xf32>
    %cst_30 = arith.constant 3.125000e-02 : f32
    %60 = vector.broadcast %cst_30 : f32 to vector<8x1xf32>
    %61 = arith.mulf %56, %60 : vector<8x1xf32>
    %cst_31 = arith.constant 3.125000e-02 : f32
    %62 = vector.broadcast %cst_31 : f32 to vector<8x1xf32>
    %63 = arith.mulf %59, %62 : vector<8x1xf32>
    %64 = arith.mulf %61, %61 : vector<8x1xf32>
    %65 = arith.subf %63, %64 : vector<8x1xf32>
    %cst_32 = arith.constant 0.000000e+00 : f32
    %66 = vector.broadcast %cst_32 : f32 to vector<8x1xf32>
    %67 = arith.maximumf %65, %66 : vector<8x1xf32>
    %cst_33 = arith.constant 9.99999974E-6 : f32
    %68 = vector.broadcast %cst_33 : f32 to vector<8x1xf32>
    %69 = arith.addf %67, %68 : vector<8x1xf32>
    %70 = math.rsqrt %69 : vector<8x1xf32>
    %71 = vector.broadcast %61 : vector<8x1xf32> to vector<8x128xf32>
    %72 = arith.subf %54, %71 : vector<8x128xf32>
    %73 = vector.broadcast %70 : vector<8x1xf32> to vector<8x128xf32>
    %74 = arith.mulf %72, %73 : vector<8x128xf32>
    %75 = vector.broadcast %4 : vector<1x128xf32> to vector<8x128xf32>
    %76 = arith.mulf %74, %75 : vector<8x128xf32>
    %77 = vector.broadcast %7 : vector<1x128xf32> to vector<8x128xf32>
    %78 = arith.addf %76, %77 : vector<8x128xf32>
    %c1_34 = arith.constant 1 : index
    %c0_35 = arith.constant 0 : index
    %c0_36 = arith.constant 0 : index
    %79 = vector.load %arg3[%c1_34, %c0_35, %c0_36] : memref<2x128x128xf32, #tpu.memory_space<vmem>>, vector<1x128x128xf32>
    %80 = vector.shape_cast %79 : vector<1x128x128xf32> to vector<128x128xf32>
    %cst_37 = arith.constant dense<0.000000e+00> : vector<8x128xf32>
    %81 = tpu.matmul %78, %80, %cst_37 {dimension_numbers = #tpu.dot_dimension_numbers<[1], [0], [0], [1], [0, 0, 1, 1], [], []>} : vector<8x128xf32>, vector<128x128xf32>, vector<8x128xf32> -> vector<8x128xf32>
    %82 = vector.broadcast %2 : vector<1x128xf32> to vector<8x128xf32>
    %83 = arith.addf %81, %82 : vector<8x128xf32>
    %cst_38 = arith.constant 0.000000e+00 : f32
    %84 = vector.broadcast %cst_38 : f32 to vector<8x128xf32>
    %85 = arith.cmpf oge, %83, %84 : vector<8x128xf32>
    %cst_39 = arith.constant 0.00999999977 : f32
    %86 = vector.broadcast %cst_39 : f32 to vector<8x128xf32>
    %87 = arith.mulf %86, %83 : vector<8x128xf32>
    %88 = arith.select %85, %83, %87 : vector<8x128xi1>, vector<8x128xf32>
    %cst_40 = arith.constant dense<0.000000e+00> : vector<8xf32>
    %89 = vector.multi_reduction <add>, %88, %cst_40 [1] : vector<8x128xf32> to vector<8xf32>
    %90 = vector.shape_cast %89 : vector<8xf32> to vector<8x1xf32>
    %91 = arith.mulf %88, %88 : vector<8x128xf32>
    %cst_41 = arith.constant dense<0.000000e+00> : vector<8xf32>
    %92 = vector.multi_reduction <add>, %91, %cst_41 [1] : vector<8x128xf32> to vector<8xf32>
    %93 = vector.shape_cast %92 : vector<8xf32> to vector<8x1xf32>
    %cst_42 = arith.constant 3.125000e-02 : f32
    %94 = vector.broadcast %cst_42 : f32 to vector<8x1xf32>
    %95 = arith.mulf %90, %94 : vector<8x1xf32>
    %cst_43 = arith.constant 3.125000e-02 : f32
    %96 = vector.broadcast %cst_43 : f32 to vector<8x1xf32>
    %97 = arith.mulf %93, %96 : vector<8x1xf32>
    %98 = arith.mulf %95, %95 : vector<8x1xf32>
    %99 = arith.subf %97, %98 : vector<8x1xf32>
    %cst_44 = arith.constant 0.000000e+00 : f32
    %100 = vector.broadcast %cst_44 : f32 to vector<8x1xf32>
    %101 = arith.maximumf %99, %100 : vector<8x1xf32>
    %cst_45 = arith.constant 9.99999974E-6 : f32
    %102 = vector.broadcast %cst_45 : f32 to vector<8x1xf32>
    %103 = arith.addf %101, %102 : vector<8x1xf32>
    %104 = math.rsqrt %103 : vector<8x1xf32>
    %105 = vector.broadcast %95 : vector<8x1xf32> to vector<8x128xf32>
    %106 = arith.subf %88, %105 : vector<8x128xf32>
    %107 = vector.broadcast %104 : vector<8x1xf32> to vector<8x128xf32>
    %108 = arith.mulf %106, %107 : vector<8x128xf32>
    %109 = vector.broadcast %5 : vector<1x128xf32> to vector<8x128xf32>
    %110 = arith.mulf %108, %109 : vector<8x128xf32>
    %111 = vector.broadcast %8 : vector<1x128xf32> to vector<8x128xf32>
    %112 = arith.addf %110, %111 : vector<8x128xf32>
    %c0_46 = arith.constant 0 : index
    %c0_47 = arith.constant 0 : index
    %113 = vector.load %arg4[%c0_46, %c0_47] : memref<128x128xf32, #tpu.memory_space<vmem>>, vector<128x128xf32>
    %cst_48 = arith.constant dense<0.000000e+00> : vector<8x128xf32>
    %114 = tpu.matmul %112, %113, %cst_48 {dimension_numbers = #tpu.dot_dimension_numbers<[1], [0], [0], [1], [0, 0, 1, 1], [], []>} : vector<8x128xf32>, vector<128x128xf32>, vector<8x128xf32> -> vector<8x128xf32>
    %115 = vector.broadcast %9 : vector<1x128xf32> to vector<8x128xf32>
    %116 = arith.addf %114, %115 : vector<8x128xf32>
    %c0_49 = arith.constant 0 : index
    %c0_50 = arith.constant 0 : index
    %117 = vector.load %arg6[%c0_49, %c0_50] : memref<8x128xf32, #tpu.memory_space<vmem>>, vector<8x128xf32>
    tpu.vector_store %arg6[%c0_49, %c0_50], %116 {strides = array<i32>} : memref<8x128xf32, #tpu.memory_space<vmem>>, vector<8x128xf32>,
    return
  }
  func.func @transform_0(%arg0: i32) -> (i32, i32) {
    %c0_i32 = arith.constant 0 : i32
    %c0_i32_0 = arith.constant 0 : i32
    return %arg0, %c0_i32 : i32, i32
  }
  func.func @transform_1(%arg0: i32) -> (i32, i32) {
    %c0_i32 = arith.constant 0 : i32
    %c0_i32_0 = arith.constant 0 : i32
    %c0_i32_1 = arith.constant 0 : i32
    return %c0_i32, %c0_i32_0 : i32, i32
  }
  func.func @transform_2(%arg0: i32) -> (i32, i32, i32) {
    %c0_i32 = arith.constant 0 : i32
    %c0_i32_0 = arith.constant 0 : i32
    %c0_i32_1 = arith.constant 0 : i32
    %c0_i32_2 = arith.constant 0 : i32
    return %c0_i32, %c0_i32_0, %c0_i32_1 : i32, i32, i32
  }
  func.func @transform_3(%arg0: i32) -> (i32, i32) {
    %c0_i32 = arith.constant 0 : i32
    %c0_i32_0 = arith.constant 0 : i32
    %c0_i32_1 = arith.constant 0 : i32
    return %c0_i32, %c0_i32_0 : i32, i32
  }
  func.func @transform_4(%arg0: i32) -> (i32, i32) {
    %c0_i32 = arith.constant 0 : i32
    %c0_i32_0 = arith.constant 0 : i32
    %c0_i32_1 = arith.constant 0 : i32
    return %c0_i32, %c0_i32_0 : i32, i32
  }
  func.func @transform_5(%arg0: i32) -> (i32, i32) {
    %c0_i32 = arith.constant 0 : i32
    %c0_i32_0 = arith.constant 0 : i32
    return %arg0, %c0_i32 : i32, i32
  }
}

</mosaic_0001>

<bundles_post_ra>
// kernel: qnetwork_forward_padded.1
= control target key start
LH: loop header
LB: loop body
LE: loop exit
PB: predicated region body
PF: predicated region fallthrough
CT: control target
= control target key end

     0   :  { %10 = vsyncpa [#allocation3], 0  ;;  %s1119_s0 = inlined_call_operand.hbm [shape: f32[8,16], index: 0, kind: input, shape index: {}]   ;;  %s1120_s1 = inlined_call_operand.hbm [shape: f32[16,128], index: 1, kind: input, shape index: {}]   ;;  %s1121_s2 = inlined_call_operand.hbm [shape: f32[2,128,128], index: 2, kind: input, shape index: {}]   ;;  %s1122_s3 = inlined_call_operand.hbm [shape: f32[128,128], index: 3, kind: input, shape index: {}]   ;;  %s1123_s4 = inlined_call_operand.hbm [shape: f32[10,128], index: 4, kind: input, shape index: {}]   ;;  %s1124_s5 = inlined_call_operand.hbm [shape: f32[8,128], index: 5, kind: output, shape index: {}]  }
   0x1   :  { %11 = vsyncpa [#allocation6], 0 }
   0x2   :  { %12 = vsyncpa [#allocation9], 0 }
   0x3   :  { %13 = vsyncpa [#allocation4], 0  ;;  %s961_s18 = smov [#allocation5]   ;;  %s821_s22 = scalar_lea.hbm %s1120_s1, 256 }
   0x4   :  { %s29_s19 = sshll.u32 %s961_s18, 4  ;;  %p822_p0 = scmp.ne.s32.totalorder %s1120_s1, %s821_s22  ;;  %s30_s19 = int_to_ptr.vmem [resolvable:$true] %s29_s19 }
   0x5   :  { %p825_p1 = scmp.lt.u32.totalorder %s821_s22, %s1120_s1 }
   0x7   :  { %p827_p2 = pnand %p825_p1, %p822_p0 }
   0x9   :  { %830 = shalt.err (!%p827_p2)
}
   0xa   :  { %s831_s27 = scalar_lea.vmem %s30_s19, 256  ;;  %p836_p4 = scmp.lt.s32.totalorder %s30_s19, %s30_s19 }
   0xb   :  { %p832_p3 = scmp.ne.s32.totalorder %s30_s19, %s831_s27  ;;  %p837_p5 = scmp.lt.s32.totalorder %s831_s27, %s831_s27 }
   0xd   :  { %p838_p6 = por %p837_p5, %p836_p4 }
   0xf   :  { %p839_p7 = pnand %p838_p6, %p832_p3 }
  0x11   :  { %842 = shalt.err (!%p839_p7)
}
  0x12   :  { %s962_s28 = smov 128   ;;  %s963_s29 = smov 8  }
  0x13   :  { %35 = dma.hbm_to_vmem [thread:$0]  %s1120_s1, 256, %s30_s19, [#allocation6], %s962_s28, %s962_s28, %s963_s29  }
  0x14   :  { %s964_s7 = smov [#allocation8]   ;;  %s965_s9 = smov [#allocation2]  }
  0x15   :  { %s53_s8 = sshll.u32 %s964_s7, 4  ;;  %s20_s10 = sshll.u32 %s965_s9, 4  ;;  %s54_s8 = int_to_ptr.vmem [resolvable:$true] %s53_s8  ;;  %s21_s10 = int_to_ptr.vmem [resolvable:$true] %s20_s10 }
  0x16   :  { %s843_s13 = scalar_lea.hbm %s1122_s3, 2048 }
  0x17   :  { %p844_p8 = scmp.ne.s32.totalorder %s1122_s3, %s843_s13  ;;  %p847_p9 = scmp.lt.u32.totalorder %s843_s13, %s1122_s3 }
  0x19   :  { %p849_p10 = pnand %p847_p9, %p844_p8 }
  0x1b   :  { %852 = shalt.err (!%p849_p10)
}
  0x1c   :  { %s853_s1 = scalar_lea.vmem %s54_s8, 2048  ;;  %p858_p12 = scmp.lt.s32.totalorder %s54_s8, %s54_s8 }
  0x1d   :  { %p854_p11 = scmp.ne.s32.totalorder %s54_s8, %s853_s1  ;;  %p859_p13 = scmp.lt.s32.totalorder %s853_s1, %s853_s1 }
  0x1f   :  { %p860_p0 = por %p859_p13, %p858_p12 }
  0x21   :  { %p861_p1 = pnand %p860_p0, %p854_p11 }
  0x23   :  { %864 = shalt.err (!%p861_p1)
}
  0x24   :  { %59 = dma.hbm_to_vmem [thread:$0]  %s1122_s3, 2048, %s54_s8, [#allocation9], %s962_s28, %s962_s28, %s963_s29  }
  0x25   :  { %s865_s22 = scalar_lea.hbm %s1119_s0, 128 }
  0x26   :  { %p866_p2 = scmp.ne.s32.totalorder %s1119_s0, %s865_s22  ;;  %p869_p3 = scmp.lt.u32.totalorder %s865_s22, %s1119_s0 }
  0x28   :  { %p871_p4 = pnand %p869_p3, %p866_p2 }
  0x2a   :  { %874 = shalt.err (!%p871_p4)
}
  0x2b   :  { %s875_s27 = scalar_lea.vmem %s21_s10, 128  ;;  %p880_p6 = scmp.lt.s32.totalorder %s21_s10, %s21_s10 }
  0x2c   :  { %p876_p5 = scmp.ne.s32.totalorder %s21_s10, %s875_s27  ;;  %p881_p7 = scmp.lt.s32.totalorder %s875_s27, %s875_s27 }
  0x2e   :  { %p882_p8 = por %p881_p7, %p880_p6 }
  0x30   :  { %p883_p9 = pnand %p882_p8, %p876_p5 }
  0x32   :  { %886 = shalt.err (!%p883_p9)
}
  0x33   :  { %23 = dma.hbm_to_vmem [thread:$0]  %s1119_s0, 128, %s21_s10, [#allocation3]  }
  0x34   :  { %s966_s6 = smov [#allocation7]   ;;  %s967_s8 = smov [#allocation10]  }
  0x35   :  { %s41_s7 = sshll.u32 %s966_s6, 4  ;;  %s65_s9 = sshll.u32 %s967_s8, 4  ;;  %s42_s7 = int_to_ptr.vmem [resolvable:$true] %s41_s7  ;;  %s66_s9 = int_to_ptr.vmem [resolvable:$true] %s65_s9 }
  0x36   :  { %s887_s13 = scalar_lea.hbm %s1121_s2, 4096 }
  0x37   :  { %p888_p10 = scmp.ne.s32.totalorder %s1121_s2, %s887_s13  ;;  %p891_p11 = scmp.lt.u32.totalorder %s887_s13, %s1121_s2 }
  0x39   :  { %p893_p12 = pnand %p891_p11, %p888_p10 }
  0x3b   :  { %896 = shalt.err (!%p893_p12)
}
  0x3c   :  { %s897_s0 = scalar_lea.vmem %s42_s7, 4096  ;;  %p902_p0 = scmp.lt.s32.totalorder %s42_s7, %s42_s7 }
  0x3d   :  { %p898_p13 = scmp.ne.s32.totalorder %s42_s7, %s897_s0  ;;  %p903_p1 = scmp.lt.s32.totalorder %s897_s0, %s897_s0 }
  0x3f   :  { %p904_p2 = por %p903_p1, %p902_p0 }
  0x41   :  { %p905_p3 = pnand %p904_p2, %p898_p13 }
  0x43   :  { %908 = shalt.err (!%p905_p3)
}
  0x44   :  { %47 = dma.hbm_to_vmem [thread:$0]  %s1121_s2, 4096, %s42_s7, [#allocation6], %s962_s28, %s962_s28, %s963_s29  }
  0x45   :  { %s909_s20 = scalar_lea.hbm %s1123_s4, 256 }
  0x46   :  { %p910_p4 = scmp.ne.s32.totalorder %s1123_s4, %s909_s20  ;;  %p913_p5 = scmp.lt.u32.totalorder %s909_s20, %s1123_s4 }
  0x48   :  { %p915_p6 = pnand %p913_p5, %p910_p4 }
  0x4a   :  { %918 = shalt.err (!%p915_p6)
}
  0x4b   :  { %s919_s25 = scalar_lea.vmem %s66_s9, 256  ;;  %p924_p8 = scmp.lt.s32.totalorder %s66_s9, %s66_s9 }
  0x4c   :  { %p920_p7 = scmp.ne.s32.totalorder %s66_s9, %s919_s25  ;;  %p925_p9 = scmp.lt.s32.totalorder %s919_s25, %s919_s25 }
  0x4e   :  { %p926_p10 = por %p925_p9, %p924_p8 }
  0x50   :  { %p927_p11 = pnand %p926_p10, %p920_p7 }
  0x52   :  { %930 = shalt.err (!%p927_p11)
}
  0x53   :  { %71 = dma.hbm_to_vmem [thread:$0]  %s1123_s4, 256, %s66_s9, [#allocation9], %s962_s28, %s962_s28, %s963_s29  }
  0x54   :  { %953 = dma.done.wait [#allocation3], 128  }
  0x55   :  { %954 = vsyncadd [#allocation3], 4294967168 }
  0x56   :  { %955 = dma.done.wait [#allocation6], 4352  }
  0x57   :  { %956 = vsyncadd [#allocation6], 4294962944 }
  0x58   :  { %957 = dma.done.wait [#allocation9], 2304  }
  0x59   :  { %958 = vsyncadd [#allocation9], 4294964992  ;;  %v968_v0 = vmov 0.0|0.0   ;;  %vm969_vm0 = vmmov 0   ;;  %v970_v1 = vmov 0.0   ;;  %v100_v2 = vld [vmem:[#allocation5] sm:$0xff] }
  0x5a   :  { %727 = vmatprep.subr.bf16.mxu0 %v968_v0  ;;  %619 = vmatprep.mubr.msk.f32.mxu0 %vm969_vm0, %v970_v1  ;;  %v101_v3 = vld [vmem:[#allocation5 + $0x8] sm:$0xff]  ;;  %v97_v4 = vld [vmem:[#allocation2] sm:$0xff]  ;;  %vm106_vm1 = vcmask 130048   ;;  %v207_v8 = vld [vmem:[#allocation7] sm:$0xff]  ;;  %s971_s4 = smov [#allocation11]  }
  0x5b   :  { %730 = vmatprep.subr.bf16.mxu1 %v968_v0  ;;  %654 = vmatprep.mubr.msk.f32.mxu1 %vm969_vm0, %v970_v1  ;;  %v728_v5 = vpack.c.bf16 %v101_v3, %v100_v2  ;;  %813 = vlog2.f32 %v97_v4  ;;  %v208_v9 = vld [vmem:[#allocation7 + $0x8] sm:$0xff]  ;;  %v550_v11 = vld [vmem:[#allocation10] ss:$0 sm:$0xff]  ;;  %v209_v18 = vld [vmem:[#allocation7 + $0x10] sm:$0xff]  ;;  %s539_s28 = sshll.u32 %s971_s4, 4  ;;  %s540_s28 = int_to_ptr.vmem [resolvable:$true] %s539_s28 }
  0x5c   :  { %v731_v10 = vpack.c.bf16 %v208_v9, %v207_v8  ;;  %v210_v19 = vld [vmem:[#allocation7 + $0x18] sm:$0xff]  ;;  %v211_v21 = vld [vmem:[#allocation7 + $0x20] sm:$0xff]  ;;  %v212_v22 = vld [vmem:[#allocation7 + $0x28] sm:$0xff]  ;;  %s931_s29 = scalar_lea.vmem %s540_s28, 128  ;;  %p936_p13 = scmp.lt.s32.totalorder %s540_s28, %s540_s28 }
  0x5d   :  { %729 = vmatpush3.bf16.msra.mxu0 %v728_v5  ;;  %v734_v20 = vpack.c.bf16 %v210_v19, %v209_v18  ;;  %v737_v23 = vpack.c.bf16 %v212_v22, %v211_v21  ;;  %v213_v24 = vld [vmem:[#allocation7 + $0x30] sm:$0xff]  ;;  %v214_v25 = vld [vmem:[#allocation7 + $0x38] sm:$0xff]  ;;  %v215_v27 = vld [vmem:[#allocation7 + $0x40] sm:$0xff]  ;;  %p932_p12 = scmp.ne.s32.totalorder %s540_s28, %s931_s29  ;;  %p937_p0 = scmp.lt.s32.totalorder %s931_s29, %s931_s29 }
  0x5e   :  { %754 = vmatprep.subr.bf16.mxu0 %v968_v0  ;;  %732 = vmatpush3.bf16.msra.mxu1 %v731_v10  ;;  %v740_v26 = vpack.c.bf16 %v214_v25, %v213_v24  ;;  %v216_v28 = vld [vmem:[#allocation7 + $0x48] sm:$0xff]  ;;  %v217_v30 = vld [vmem:[#allocation7 + $0x50] sm:$0xff]  ;;  %v218_v31 = vld [vmem:[#allocation7 + $0x58] sm:$0xff] }
  0x5f   :  { %733 = vmatprep.subr.bf16.mxu1 %v968_v0  ;;  %v743_v29 = vpack.c.bf16 %v216_v28, %v215_v27  ;;  %v746_v32 = vpack.c.bf16 %v218_v31, %v217_v30  ;;  %v219_v33 = vld [vmem:[#allocation7 + $0x60] sm:$0xff]  ;;  %v220_v34 = vld [vmem:[#allocation7 + $0x68] sm:$0xff]  ;;  %v221_v36 = vld [vmem:[#allocation7 + $0x70] sm:$0xff]  ;;  %p938_p1 = por %p937_p0, %p936_p13 }
  0x60   :  { %v749_v35 = vpack.c.bf16 %v220_v34, %v219_v33  ;;  %v222_v37 = vld [vmem:[#allocation7 + $0x78] sm:$0xff]  ;;  %v552_v49 = vld [vmem:[#allocation10 + $0x3] ss:$0 sm:$0xff]  ;;  %v553_v51 = vld [vmem:[#allocation10 + $0x6] ss:$0 sm:$0xff] }
  0x61   :  { %v752_v38 = vpack.c.bf16 %v222_v37, %v221_v36  ;;  %v325_v54 = vld [vmem:[#allocation7 + $0x80] sm:$0xff]  ;;  %v326_v55 = vld [vmem:[#allocation7 + $0x88] sm:$0xff]  ;;  %v327_v2 = vld [vmem:[#allocation7 + $0x90] sm:$0xff]  ;;  %p939_p2 = pnand %p938_p1, %p932_p12 }
  0x62   :  { %735 = vmatpush3.bf16.msra.mxu1 %v734_v20  ;;  %v755_v56 = vpack.c.bf16 %v326_v55, %v325_v54  ;;  %v554_v57 = vld [vmem:[#allocation10 + $0x1] ss:$0 sm:$0xff]  ;;  %v328_v3 = vld [vmem:[#allocation7 + $0x98] sm:$0xff]  ;;  %v330_v5 = vld [vmem:[#allocation7 + $0xa8] sm:$0xff] }
  0x63   :  { %736 = vmatprep.subr.bf16.mxu1 %v968_v0  ;;  %v758_v4 = vpack.c.bf16 %v328_v3, %v327_v2  ;;  %v332_v8 = vld [vmem:[#allocation7 + $0xb8] sm:$0xff]  ;;  %v333_v10 = vld [vmem:[#allocation7 + $0xc0] sm:$0xff]  ;;  %v339_v19 = vld [vmem:[#allocation7 + $0xf0] sm:$0xff] }
  0x64   :  { %v340_v20 = vld [vmem:[#allocation7 + $0xf8] sm:$0xff]  ;;  %v556_v34 = vld [vmem:[#allocation10 + $0x7] ss:$0 sm:$0xff]  ;;  %v456_v3 = vld [vmem:[#allocation8 + $0x70] sm:$0xff] }
  0x65   :  { %v814_v6 = vpop.eup %813  ;;  %v776_v21 = vpack.c.bf16 %v340_v20, %v339_v19  ;;  %v442_v37 = vld [vmem:[#allocation8] sm:$0xff]  ;;  %v449_v54 = vld [vmem:[#allocation8 + $0x38] sm:$0xff]  ;;  %v560_v20 = vld [vmem:[#allocation10 + $0x9] ss:$0 sm:$0xff] }
  0x66   :  { %v99_v7 = vmul.f32 0.6931472, %v814_v6  ;;  %738 = vmatpush3.bf16.msra.mxu1 %v737_v23 }
  0x67   :  { %739 = vmatprep.subr.bf16.mxu1 %v968_v0 }
  0x68   :  { %620 = vmatmul.mubr.msk.f32.vlgmr.msra.gmra.mrb[0].mxu0 %vm106_vm1, %v99_v7  ;;  %v331_v7 = vld [vmem:[#allocation7 + $0xb0] sm:$0xff] }
  0x69   :  { %689 = vmatprep.mubr.msk.f32.mxu0 %vm969_vm0, %v970_v1  ;;  %756 = vmatpush3.bf16.msra.mxu0 %v755_v56  ;;  %v764_v9 = vpack.c.bf16 %v332_v8, %v331_v7  ;;  %v450_v56 = vld [vmem:[#allocation8 + $0x40] sm:$0xff] }
  0x6a   :  { %741 = vmatpush3.bf16.msra.mxu1 %v740_v26  ;;  %757 = vmatprep.subr.bf16.mxu0 %v968_v0 }
  0x6b   :  { %742 = vmatprep.subr.bf16.mxu1 %v968_v0 }
  0x6d   :  { %759 = vmatpush3.bf16.msra.mxu0 %v758_v4  ;;  %v457_v4 = vld [vmem:[#allocation8 + $0x78] sm:$0xff] }
  0x6e   :  { %744 = vmatpush3.bf16.msra.mxu1 %v743_v29  ;;  %760 = vmatprep.subr.bf16.mxu0 %v968_v0 }
  0x6f   :  { %745 = vmatprep.subr.bf16.mxu1 %v968_v0 }
  0x72   :  { %747 = vmatpush3.bf16.msra.mxu1 %v746_v32  ;;  %v555_v32 = vld [vmem:[#allocation10 + $0x4] ss:$0 sm:$0xff] }
  0x73   :  { %748 = vmatprep.subr.bf16.mxu1 %v968_v0 }
  0x76   :  { %750 = vmatpush3.bf16.msra.mxu1 %v749_v35 }
  0x77   :  { %751 = vmatprep.subr.bf16.mxu1 %v968_v0 }
  0x7a   :  { %753 = vmatpush3.bf16.msra.mxu1 %v752_v38  ;;  %v443_v38 = vld [vmem:[#allocation8 + $0x8] sm:$0xff] }
  0x7b   :  { %778 = vmatprep.subr.bf16.mxu1 %v968_v0 }
 0x13b   :  { %v176_v12 = vpop.f32.mrb[0].mxu0 }
 0x13c   :  { %v177_v13 = vadd.f32 %v550_v11, %v176_v12  ;;  %v621_v14 = vpop.f32.mrb[1].mxu0  ;;  %v334_v11 = vld [vmem:[#allocation7 + $0xc8] sm:$0xff] }
 0x13d   :  { %v767_v12 = vpack.c.bf16 %v334_v11, %v333_v10  ;;  %v336_v14 = vld [vmem:[#allocation7 + $0xd8] sm:$0xff] }
 0x13e   :  { %v181_v15 = vmul.f32 0.01, %v177_v13  ;;  %vm180_vm2 = vcmp.ge.f32.partialorder %v177_v13, 0.0 }
 0x140   :  { %v182_v16 = vsel %vm180_vm2, %v177_v13, %v181_v15  ;;  %v335_v13 = vld [vmem:[#allocation7 + $0xd0] sm:$0xff] }
 0x141   :  { %183 = vadd.xlane.f32.xlu0 %v182_v16  ;;  %v185_v17 = vmul.f32 %v182_v16, %v182_v16  ;;  %v770_v15 = vpack.c.bf16 %v336_v14, %v335_v13 }
 0x145   :  { %186 = vadd.xlane.f32.xlu0 %v185_v17  ;;  %v338_v17 = vld [vmem:[#allocation7 + $0xe8] sm:$0xff] }
 0x1ce   :  { %v184_v39 = vpop.xlane.xlu0 %183 }
 0x1cf   :  { %v188_v40 = vmul.f32 0.03125, %v184_v39  ;;  %v779_v39 = vpack.c.bf16 %v443_v38, %v442_v37 }
 0x1d1   :  { %v190_v42 = vmul.f32 %v188_v40, %v188_v40  ;;  %v195_v47 = vsub.f32 %v182_v16, %v188_v40  ;;  %v337_v16 = vld [vmem:[#allocation7 + $0xe0] sm:$0xff] }
 0x1d2   :  { %v187_v41 = vpop.xlane.xlu0 %186  ;;  %v773_v18 = vpack.c.bf16 %v338_v17, %v337_v16  ;;  %v557_v40 = vld [vmem:[#allocation10 + $0x2] ss:$0 sm:$0xff]  ;;  %v559_v17 = vld [vmem:[#allocation10 + $0x8] ss:$0 sm:$0xff] }
 0x1d3   :  { %v189_v43 = vmul.f32 0.03125, %v187_v41 }
 0x1d5   :  { %v191_v44 = vsub.f32 %v189_v43, %v190_v42 }
 0x1d7   :  { %v192_v45 = vmax.f32 %v191_v44, 0.0 }
 0x1d9   :  { %v193_v46 = vadd.f32 1e-05, %v192_v45 }
 0x1db   :  { %815 = vrsqrt.f32 %v193_v46 }
 0x1e5   :  { %v816_v48 = vpop.eup %815 }
 0x1e6   :  { %v196_v50 = vmul.f32 %v816_v48, %v195_v47  ;;  %v444_v47 = vld [vmem:[#allocation8 + $0x10] sm:$0xff]  ;;  %v445_v48 = vld [vmem:[#allocation8 + $0x18] sm:$0xff] }
 0x1e8   :  { %v201_v52 = vmul.f32 %v552_v49, %v196_v50  ;;  %v782_v49 = vpack.c.bf16 %v445_v48, %v444_v47  ;;  %v446_v50 = vld [vmem:[#allocation8 + $0x20] sm:$0xff] }
 0x1ea   :  { %v206_v53 = vadd.f32 %v553_v51, %v201_v52  ;;  %v447_v51 = vld [vmem:[#allocation8 + $0x28] sm:$0xff] }
 0x1eb   :  { %v785_v52 = vpack.c.bf16 %v447_v51, %v446_v50 }
 0x1ec   :  { %655 = vmatmul.mubr.f32.vlgmr.msra.gmra.mrb[0].mxu1 %v206_v53  ;;  %v448_v53 = vld [vmem:[#allocation8 + $0x30] sm:$0xff] }
 0x1ed   :  { %724 = vmatprep.mubr.msk.f32.mxu1 %vm969_vm0, %v970_v1  ;;  %v329_v1 = vld [vmem:[#allocation7 + $0xa0] sm:$0xff]  ;;  %780 = vmatpush3.bf16.msra.mxu1 %v779_v39  ;;  %v788_v55 = vpack.c.bf16 %v449_v54, %v448_v53 }
 0x1ee   :  { %v761_v6 = vpack.c.bf16 %v330_v5, %v329_v1  ;;  %781 = vmatprep.subr.bf16.mxu1 %v968_v0  ;;  %v800_v1 = vpack.c.bf16 %v457_v4, %v456_v3 }
 0x1f0   :  { %762 = vmatpush3.bf16.msra.mxu0 %v761_v6 }
 0x1f1   :  { %763 = vmatprep.subr.bf16.mxu0 %v968_v0  ;;  %783 = vmatpush3.bf16.msra.mxu1 %v782_v49 }
 0x1f2   :  { %784 = vmatprep.subr.bf16.mxu1 %v968_v0 }
 0x1f4   :  { %765 = vmatpush3.bf16.msra.mxu0 %v764_v9 }
 0x1f5   :  { %766 = vmatprep.subr.bf16.mxu0 %v968_v0  ;;  %786 = vmatpush3.bf16.msra.mxu1 %v785_v52 }
 0x1f6   :  { %787 = vmatprep.subr.bf16.mxu1 %v968_v0 }
 0x1f8   :  { %768 = vmatpush3.bf16.msra.mxu0 %v767_v12 }
 0x1f9   :  { %769 = vmatprep.subr.bf16.mxu0 %v968_v0  ;;  %789 = vmatpush3.bf16.msra.mxu1 %v788_v55 }
 0x1fa   :  { %790 = vmatprep.subr.bf16.mxu1 %v968_v0 }
 0x1fc   :  { %771 = vmatpush3.bf16.msra.mxu0 %v770_v15  ;;  %v558_v15 = vld [vmem:[#allocation10 + $0x5] ss:$0 sm:$0xff] }
 0x1fd   :  { %772 = vmatprep.subr.bf16.mxu0 %v968_v0 }
 0x200   :  { %774 = vmatpush3.bf16.msra.mxu0 %v773_v18 }
 0x201   :  { %775 = vmatprep.subr.bf16.mxu0 %v968_v0 }
 0x204   :  { %777 = vmatpush3.bf16.msra.mxu0 %v776_v21 }
 0x2bf   :  { %v293_v58 = vpop.f32.mrb[0].mxu1 }
 0x2c0   :  { %v294_v59 = vadd.f32 %v554_v57, %v293_v58  ;;  %v656_v60 = vpop.f32.mrb[1].mxu1  ;;  %v451_v57 = vld [vmem:[#allocation8 + $0x48] sm:$0xff] }
 0x2c1   :  { %v791_v58 = vpack.c.bf16 %v451_v57, %v450_v56  ;;  %v453_v60 = vld [vmem:[#allocation8 + $0x58] sm:$0xff] }
 0x2c2   :  { %v298_v61 = vmul.f32 0.01, %v294_v59  ;;  %vm297_vm3 = vcmp.ge.f32.partialorder %v294_v59, 0.0 }
 0x2c3   :  { %792 = vmatpush3.bf16.msra.mxu1 %v791_v58 }
 0x2c4   :  { %v299_v62 = vsel %vm297_vm3, %v294_v59, %v298_v61  ;;  %v452_v59 = vld [vmem:[#allocation8 + $0x50] sm:$0xff]  ;;  %793 = vmatprep.subr.bf16.mxu1 %v968_v0 }
 0x2c5   :  { %300 = vadd.xlane.f32.xlu1 %v299_v62  ;;  %v302_v63 = vmul.f32 %v299_v62, %v299_v62  ;;  %v794_v61 = vpack.c.bf16 %v453_v60, %v452_v59 }
 0x2c7   :  { %795 = vmatpush3.bf16.msra.mxu1 %v794_v61 }
 0x2c8   :  { %796 = vmatprep.subr.bf16.mxu1 %v968_v0 }
 0x2c9   :  { %303 = vadd.xlane.f32.xlu1 %v302_v63  ;;  %v455_v63 = vld [vmem:[#allocation8 + $0x68] sm:$0xff] }
 0x352   :  { %v301_v22 = vpop.xlane.xlu1 %300 }
 0x353   :  { %v305_v23 = vmul.f32 0.03125, %v301_v22 }
 0x355   :  { %v307_v25 = vmul.f32 %v305_v23, %v305_v23  ;;  %v312_v30 = vsub.f32 %v299_v62, %v305_v23  ;;  %v454_v62 = vld [vmem:[#allocation8 + $0x60] sm:$0xff] }
 0x356   :  { %v304_v24 = vpop.xlane.xlu1 %303  ;;  %v797_v2 = vpack.c.bf16 %v455_v63, %v454_v62 }
 0x357   :  { %v306_v26 = vmul.f32 0.03125, %v304_v24 }
 0x358   :  { %798 = vmatpush3.bf16.msra.mxu1 %v797_v2 }
 0x359   :  { %v308_v27 = vsub.f32 %v306_v26, %v307_v25  ;;  %799 = vmatprep.subr.bf16.mxu1 %v968_v0 }
 0x35b   :  { %v309_v28 = vmax.f32 %v308_v27, 0.0 }
 0x35c   :  { %801 = vmatpush3.bf16.msra.mxu1 %v800_v1 }
 0x35d   :  { %v310_v29 = vadd.f32 1e-05, %v309_v28 }
 0x35f   :  { %817 = vrsqrt.f32 %v310_v29 }
 0x369   :  { %v818_v31 = vpop.eup %817 }
 0x36a   :  { %v313_v33 = vmul.f32 %v818_v31, %v312_v30 }
 0x36c   :  { %v318_v35 = vmul.f32 %v555_v32, %v313_v33 }
 0x36e   :  { %v323_v36 = vadd.f32 %v556_v34, %v318_v35 }
 0x370   :  { %690 = vmatmul.mubr.f32.vlgmr.msra.gmra.mrb[2].mxu0 %v323_v36 }
 0x443   :  { %v411_v41 = vpop.f32.mrb[2].mxu0 }
 0x444   :  { %v412_v42 = vadd.f32 %v557_v40, %v411_v41  ;;  %v691_v43 = vpop.f32.mrb[3].mxu0 }
 0x446   :  { %v416_v44 = vmul.f32 0.01, %v412_v42  ;;  %vm415_vm4 = vcmp.ge.f32.partialorder %v412_v42, 0.0 }
 0x448   :  { %v417_v45 = vsel %vm415_vm4, %v412_v42, %v416_v44 }
 0x449   :  { %418 = vadd.xlane.f32.xlu0 %v417_v45  ;;  %v420_v46 = vmul.f32 %v417_v45, %v417_v45 }
 0x44b   :  { %421 = vadd.xlane.f32.xlu1 %v420_v46 }
 0x4d6   :  { %v419_v5 = vpop.xlane.xlu0 %418 }
 0x4d7   :  { %v423_v6 = vmul.f32 0.03125, %v419_v5 }
 0x4d8   :  { %v422_v7 = vpop.xlane.xlu1 %421 }
 0x4d9   :  { %v425_v8 = vmul.f32 %v423_v6, %v423_v6  ;;  %v424_v9 = vmul.f32 0.03125, %v422_v7  ;;  %v430_v13 = vsub.f32 %v417_v45, %v423_v6 }
 0x4db   :  { %v426_v10 = vsub.f32 %v424_v9, %v425_v8 }
 0x4dd   :  { %v427_v11 = vmax.f32 %v426_v10, 0.0 }
 0x4df   :  { %v428_v12 = vadd.f32 1e-05, %v427_v11 }
 0x4e1   :  { %819 = vrsqrt.f32 %v428_v12 }
 0x4eb   :  { %v820_v14 = vpop.eup %819 }
 0x4ec   :  { %v431_v16 = vmul.f32 %v820_v14, %v430_v13 }
 0x4ee   :  { %v436_v18 = vmul.f32 %v558_v15, %v431_v16 }
 0x4f0   :  { %v441_v19 = vadd.f32 %v559_v17, %v436_v18 }
 0x4f2   :  { %725 = vmatmul.mubr.f32.vlgmr.msra.gmra.mrb[2].mxu1 %v441_v19 }
 0x5c5   :  { %v528_v0 = vpop.f32.mrb[2].mxu1 }
 0x5c6   :  { %v529_v21 = vadd.f32 %v560_v20, %v528_v0  ;;  %v726_v22 = vpop.f32.mrb[3].mxu1 }
 0x5c8   :  { %532 = vst [vmem:[#allocation11] sm:$0xff] %v529_v21 }
 0x5c9   :  { %942 = shalt.err (!%p939_p2)
}
 0x5ca   :  { %s943_s30 = scalar_lea.hbm %s1124_s5, 128 }
 0x5cb   :  { %p944_p3 = scmp.ne.s32.totalorder %s1124_s5, %s943_s30  ;;  %p947_p4 = scmp.lt.u32.totalorder %s943_s30, %s1124_s5 }
 0x5cd   :  { %p949_p5 = pnand %p947_p4, %p944_p3 }
 0x5cf   :  { %952 = shalt.err (!%p949_p5)
}
 0x5d0   :  { %542 = dma.vmem_to_hbm [thread:$0]  %s540_s28, 128, %s1124_s5, [#allocation4]  }
 0x5d1   :  { %959 = dma.done.wait [#allocation4], 128  }
 0x5d2   :  { %960 = vsyncadd [#allocation4], 4294967168 }
 0x5d3   :  { %546 = vsyncpa [#allocation3], 1 }
 0x5d4   :  { %547 = vsyncpa [#allocation6], 1 }
 0x5d5   :  { %548 = vsyncpa [#allocation9], 1 }
 0x5d6   :  { %549 = vsyncpa [#allocation4], 1 }

</bundles_post_ra>
